<compile_context>
chip_gen: v5e
topology: v5e:2x2
jax: 0.10.0
libtpu: 0.0.40
codegen_flags: <defaults>
</compile_context>

<pallas_src>
import jax
import jax.numpy as jnp
from jax.experimental import pallas as pl
from jax.experimental.pallas import tpu as pltpu

EPS = 1e-5  # torch.nn.BatchNorm2d default eps


def _bn_relu_kernel(x_ref, sb_ref, o_ref):
    # x_ref: (row_block, col_block); sb_ref: (row_block, 2) packed [scale, bias].
    # Compute in f32 (VALU has ample slack at the HBM roofline), cast on store.
    x = x_ref[...].astype(jnp.float32)
    scale = sb_ref[:, 0:1]  # (row_block, 1) -> lane-broadcast (free on VPU)
    bias = sb_ref[:, 1:2]
    y = x * scale + bias
    o_ref[...] = jnp.maximum(y, 0.0).astype(o_ref.dtype)


def _vmem_capacity_bytes():
    try:
        return int(pltpu.get_tpu_info().vmem_capacity_bytes)
    except Exception:
        return 64 << 20  # conservative fallback (v7x per-TC VMEM)


def _choose_blocks(rows, cols, itemsize, max_tile_bytes, row_align,
                   max_col_block=4096, max_row_block=512):
    """Pick balanced, aligned (row_block, col_block) within the tile budget."""
    # Column block: lane-dense (multiple of 128) with balanced remainders.
    if cols <= max_col_block:
        col_block, n_col = cols, 1
    else:
        n_col = pl.cdiv(cols, max_col_block)
        col_block = 128 * (-(-cols // (128 * n_col)))   # 128 * ceil
        n_col = pl.cdiv(cols, col_block)

    # Row block: fill the remaining per-tile byte budget, sublane-aligned.
    rows_by_budget = max(row_align, max_tile_bytes // max(1, col_block * itemsize))
    row_cap = min(max_row_block, rows_by_budget)
    if rows <= row_cap:
        row_block, n_row = rows, 1
    else:
        n_row = pl.cdiv(rows, row_cap)
        row_block = row_align * (-(-rows // (row_align * n_row)))
        n_row = pl.cdiv(rows, row_block)

    # If the whole array fits in one big tile but is still sizeable, split the
    # column axis so v7x's two TensorCores can both stream HBM.
    if n_row * n_col == 1 and cols >= 2048:
        col_block = 128 * (-(-cols // (128 * 2)))
        n_col = pl.cdiv(cols, col_block)

    return row_block, col_block, n_row, n_col


def my_layer_forward(x_nchw, gamma, beta, running_mean, running_var,
                     *, donate_input=False):
    """Equivalent of MyLayer.forward (eval-mode BN + ReLU). x is NCHW.

    Note: implements inference BatchNorm (running stats); assumes contiguous
    NCHW input (otherwise XLA inserts a hidden copy before the reshape).
    """
    n, c, h, w = x_nchw.shape
    rows, cols = n * c, h * w

    # Layout-preserving flatten: row index = n_idx*C + c_idx, lanes = spatial.
    x2d = x_nchw.reshape(rows, cols)
    itemsize = jnp.dtype(x2d.dtype).itemsize

    # Fold eval-mode BN into per-channel scale/bias once (f32), replicate per
    # row, and pack into a single (rows, 2) array: [:, 0]=scale, [:, 1]=bias.
    inv_std = jax.lax.rsqrt(running_var.astype(jnp.float32) + EPS)
    scale_c = gamma.astype(jnp.float32) * inv_std
    bias_c = beta.astype(jnp.float32) - running_mean.astype(jnp.float32) * scale_c
    scale_rows = jnp.tile(scale_c, n)
    bias_rows = jnp.tile(bias_c, n)
    scale_bias = jnp.stack([scale_rows, bias_rows], axis=1)  # (rows, 2) f32

    # Generation-aware tile budget: 8 MiB tiles on 128 MiB-VMEM chips
    # (v5e/v6e), 4 MiB tiles on v7x (64 MiB per TC).
    vmem_cap = _vmem_capacity_bytes()
    max_tile_bytes = (8 << 20) if vmem_cap >= (96 << 20) else (4 << 20)
    # Sublane alignment depends on dtype packing (f32->8, bf16->16, int8->32).
    row_align = {4: 8, 2: 16, 1: 32}.get(itemsize, 8)

    row_block, col_block, n_row, n_col = _choose_blocks(
        rows, cols, itemsize, max_tile_bytes, row_align)
    grid = (n_row, n_col)  # column axis innermost: params re-DMA'd only per row-block

    # VMEM limit derived from the chosen blocks: double-buffered in + out tile
    # plus the tiny packed-param tile, plus headroom; clamped to physical VMEM.
    tile_bytes = row_block * col_block * itemsize
    param_bytes = row_block * 2 * 4
    vmem_limit = 2 * (2 * tile_bytes + param_bytes) + (4 << 20)
    vmem_limit = min(max(vmem_limit, 32 << 20), int(0.85 * vmem_cap))

    out2d = pl.pallas_call(
        _bn_relu_kernel,
        out_shape=jax.ShapeDtypeStruct((rows, cols), x2d.dtype),
        grid_spec=pltpu.PrefetchScalarGridSpec(
            num_scalar_prefetch=0,
            grid=grid,
            in_specs=[
                pl.BlockSpec((row_block, col_block), lambda i, j: (i, j)),
                pl.BlockSpec((row_block, 2), lambda i, j: (i, 0)),
            ],
            out_specs=pl.BlockSpec((row_block, col_block), lambda i, j: (i, j)),
        ),
        compiler_params=pltpu.CompilerParams(
            dimension_semantics=("parallel", "parallel"),
            vmem_limit_bytes=vmem_limit,
        ),
        input_output_aliases=({0: 0} if donate_input else {}),
    )(x2d, scale_bias)

    return out2d.reshape(n, c, h, w)


if __name__ == "__main__":
    # Small shapes consistent with the module: batch=2, channels=4, spatial=16.
    N, C, H, W = 2, 4, 16, 16

    key = jax.random.PRNGKey(0)
    kx, kg, kb, km, kv = jax.random.split(key, 5)

    x = jax.random.normal(kx, (N, C, H, W), dtype=jnp.float32)

    # Deterministic synthetic BN parameters (as if taken from a trained bn1).
    gamma = 1.0 + 0.1 * jax.random.normal(kg, (C,), dtype=jnp.float32)
    beta = 0.1 * jax.random.normal(kb, (C,), dtype=jnp.float32)
    running_mean = 0.5 * jax.random.normal(km, (C,), dtype=jnp.float32)
    running_var = jnp.abs(jax.random.normal(kv, (C,), dtype=jnp.float32)) + 0.5

    out = my_layer_forward(x, gamma, beta, running_mean, running_var)
    out = jax.block_until_ready(out)

    # Pure-JAX reference of eval-mode BN + ReLU.
    ref = (x - running_mean[None, :, None, None]) * (
        gamma[None, :, None, None]
        / jnp.sqrt(running_var[None, :, None, None] + EPS)
    ) + beta[None, :, None, None]
    ref = jnp.maximum(ref, 0.0)
    assert out.shape == (N, C, H, W)
    assert jnp.allclose(out, ref, atol=1e-5, rtol=1e-5)

    print("KERNEL_OK")
</pallas_src>

<mosaic_0001>
module attributes {stable_mosaic.version = 11 : i64} {
  func.func @_bn_relu_kernel(%arg0: i32, %arg1: i32, %arg2: memref<8x256xf32, #tpu.memory_space<vmem>>, %arg3: memref<8x2xf32, #tpu.memory_space<vmem>>, %arg4: memref<8x256xf32, #tpu.memory_space<vmem>>) attributes {dimension_semantics = [#tpu.dimension_semantics<parallel>, #tpu.dimension_semantics<parallel>], iteration_bounds = array<i64: 1, 1>, scalar_prefetch = 0 : i64, scratch_operands = 0 : i64, tpu.core_type = #tpu.core_type<tc>, window_params = [{transform_indices = @transform_0, window_bounds = array<i64: 8, 256>}, {transform_indices = @transform_1, window_bounds = array<i64: 8, 2>}, {transform_indices = @transform_2, window_bounds = array<i64: 8, 256>}]} {
    %c0 = arith.constant 0 : index
    %c0_0 = arith.constant 0 : index
    %0 = vector.load %arg2[%c0, %c0_0] : memref<8x256xf32, #tpu.memory_space<vmem>>, vector<8x256xf32>
    %c0_1 = arith.constant 0 : index
    %c0_2 = arith.constant 0 : index
    %1 = vector.load %arg3[%c0_1, %c0_2] : memref<8x2xf32, #tpu.memory_space<vmem>>, vector<8x1xf32>
    %c0_3 = arith.constant 0 : index
    %c1 = arith.constant 1 : index
    %2 = vector.load %arg3[%c0_3, %c1] : memref<8x2xf32, #tpu.memory_space<vmem>>, vector<8x1xf32>
    %3 = vector.broadcast %1 : vector<8x1xf32> to vector<8x256xf32>
    %4 = arith.mulf %0, %3 : vector<8x256xf32>
    %5 = vector.broadcast %2 : vector<8x1xf32> to vector<8x256xf32>
    %6 = arith.addf %4, %5 : vector<8x256xf32>
    %cst = arith.constant 0.000000e+00 : f32
    %7 = vector.broadcast %cst : f32 to vector<8x256xf32>
    %8 = arith.maximumf %6, %7 : vector<8x256xf32>
    %c0_4 = arith.constant 0 : index
    %c0_5 = arith.constant 0 : index
    %9 = vector.load %arg4[%c0_4, %c0_5] : memref<8x256xf32, #tpu.memory_space<vmem>>, vector<8x256xf32>
    tpu.vector_store %arg4[%c0_4, %c0_5], %8 {strides = array<i32>} : memref<8x256xf32, #tpu.memory_space<vmem>>, vector<8x256xf32>,
    return
  }
  func.func @transform_0(%arg0: i32, %arg1: i32) -> (i32, i32) {
    %c0_i32 = arith.constant 0 : i32
    return %arg0, %arg1 : i32, i32
  }
  func.func @transform_1(%arg0: i32, %arg1: i32) -> (i32, i32) {
    %c0_i32 = arith.constant 0 : i32
    %c0_i32_0 = arith.constant 0 : i32
    return %arg0, %c0_i32 : i32, i32
  }
  func.func @transform_2(%arg0: i32, %arg1: i32) -> (i32, i32) {
    %c0_i32 = arith.constant 0 : i32
    return %arg0, %arg1 : i32, i32
  }
}

</mosaic_0001>

<bundles_post_ra>
// kernel: tpu_custom_call.1
= control target key start
LH: loop header
LB: loop body
LE: loop exit
PB: predicated region body
PF: predicated region fallthrough
CT: control target
= control target key end

     0   :  { %7 = vsyncpa [#allocation3], 0  ;;  %s149_s0 = inlined_call_operand.hbm [shape: f32[8,256], index: 0, kind: input, shape index: {}]   ;;  %s150_s1 = inlined_call_operand.vmem [shape: f32[8,2], index: 1, kind: input, shape index: {}]   ;;  %s151_s2 = inlined_call_operand.hbm [shape: f32[8,256], index: 2, kind: output, shape index: {}]  }
   0x1   :  { %8 = vsyncpa [#allocation4], 0  ;;  %s14_s11 = sshll.u32 %s149_s0, 4  ;;  %s121_s12 = smov [#allocation2]   ;;  %s15_s11 = int_to_ptr.hbm [resolvable:$true] %s14_s11 }
   0x2   :  { %s16_s13 = sshll.u32 %s121_s12, 4  ;;  %s17_s13 = int_to_ptr.vmem [resolvable:$true] %s16_s13 }
   0x3   :  { %19 = dma.hbm_to_vmem [thread:$0]  %s15_s11, 256, %s17_s13, [#allocation3]  }
   0x4   :  { %117 = dma.done.wait [#allocation3], 256  }
   0x5   :  { %118 = vsyncadd [#allocation3], 4294967040  ;;  %v122_v0 = vmov 0   ;;  %v28_v1 = vld [vmem:[%s150_s1] sm:$0xff]  ;;  %v123_v2 = vmov 1   ;;  %v27_v5 = vld [vmem:[#allocation2 + $0x8] sm:$0xff] }
   0x6   :  { %67 = vset.pattern.permute.xlu0 %v122_v0  ;;  %v26_v4 = vld [vmem:[#allocation2] sm:$0xff]  ;;  %s124_s0 = smov [#allocation5]   ;;  %s53_s19 = sshll.u32 %s151_s2, 4  ;;  %s54_s19 = int_to_ptr.hbm [resolvable:$true] %s53_s19 }
   0x7   :  { %31 = vperm.xlu0 %67, %v28_v1   ;;  %s51_s16 = sshll.u32 %s124_s0, 4  ;;  %s52_s16 = int_to_ptr.vmem [resolvable:$true] %s51_s16 }
   0xf   :  { %68 = vset.pattern.permute.xlu0 %v123_v2 }
  0x10   :  { %37 = vperm.xlu0 %68, %v28_v1  }
  0x79   :  { %v32_v3 = vpop.permute.xlu0 %31 }
  0x7a   :  { %v34_v6 = vmul.f32 %v32_v3, %v26_v4  ;;  %v35_v7 = vmul.f32 %v32_v3, %v27_v5 }
  0x82   :  { %v38_v8 = vpop.permute.xlu0 %37 }
  0x83   :  { %v40_v9 = vadd.f32 %v38_v8, %v34_v6  ;;  %v41_v10 = vadd.f32 %v38_v8, %v35_v7 }
  0x85   :  { %v42_v11 = vmax.f32 %v40_v9, 0.0  ;;  %v43_v12 = vmax.f32 %v41_v10, 0.0 }
  0x87   :  { %44 = vst [vmem:[#allocation5] sm:$0xff] %v42_v11 }
  0x88   :  { %45 = vst [vmem:[#allocation5 + $0x8] sm:$0xff] %v43_v12 }
  0x89   :  { %56 = dma.vmem_to_hbm [thread:$0]  %s52_s16, 256, %s54_s19, [#allocation4]  }
  0x8a   :  { %119 = dma.done.wait [#allocation4], 256  }
  0x8b   :  { %120 = vsyncadd [#allocation4], 4294967040 }
  0x8c   :  { %61 = vsyncpa [#allocation3], 1 }
  0x8d   :  { %62 = vsyncpa [#allocation4], 1 }

</bundles_post_ra>
